<compile_context>
chip_gen: v6e
topology: v6e:2x2x1
jax: 0.10.0
libtpu: 0.0.40
codegen_flags: <defaults>
</compile_context>

<pallas_src>
import jax
import jax.numpy as jnp
from jax.experimental import pallas as pl
from jax.experimental.pallas import tpu as pltpu


def _binary_tanh_kernel(x_ref, o_ref):
    one = jnp.ones((), dtype=o_ref.dtype)
    # Fused "hardtanh -> binarize": sign of x (>=0 -> +1, <0 -> -1).
    o_ref[...] = jnp.where(x_ref[...] >= 0, one, -one)


def binary_tanh(
    x: jax.Array,
    *,
    out_dtype=None,
    min_pallas_elements: int = 65536,
    alias_input: bool = False,
) -> jax.Array:
    """BinaryTanh forward. Accepts any shape; returns same shape.

    out_dtype: optional narrower dtype for the +/-1 output (e.g. jnp.int8 or
      jnp.bfloat16) to reduce HBM write traffic. Defaults to x.dtype.
    alias_input: alias the output HBM buffer onto the input. Only beneficial
      when the caller donates the input buffer (jit donate_argnums); otherwise
      XLA inserts a defensive copy, so it is off by default.
    """
    orig_shape = x.shape
    in_dtype = x.dtype
    out_dtype = in_dtype if out_dtype is None else jnp.dtype(out_dtype)
    n = int(x.size)

    def _xla_path(v):
        one = jnp.ones((), dtype=out_dtype)
        return jnp.where(v >= 0, one, -one)

    if n == 0:
        return x.astype(out_dtype)

    # Tiny inputs: fixed pallas_call launch + DMA-setup cost dominates; the
    # fused XLA op is strictly faster and needs no layout plumbing.
    if n < min_pallas_elements:
        return _xla_path(x)

    # Largest lane-dense width (multiple of 128, <= 4096) that divides n
    # exactly, so no pad/concatenate or trailing slice is ever needed.
    width = 0
    for w in range(4096, 127, -128):
        if n % w == 0:
            width = w
            break
    if width == 0:
        # No clean lane-dense factorization: padding would add two extra
        # full-array HBM passes on a purely bandwidth-bound op, so just let
        # XLA fuse it.
        return _xla_path(x)

    rows = n // width
    in_itemsize = jnp.dtype(in_dtype).itemsize
    out_itemsize = jnp.dtype(out_dtype).itemsize
    itemsize = max(in_itemsize, out_itemsize)
    # Native sublane packing: 8 (f32), 16 (bf16), 32 (int8/fp8).
    pack = max(8, 32 // min(in_itemsize, out_itemsize))

    slab_bytes = rows * width * itemsize
    if slab_bytes <= 512 * 1024:
        # Small slab: single block covering the whole array (block == full
        # dims, so no (8,128) divisibility requirement). Launch overhead
        # dominates here anyway.
        block_rows = rows
    else:
        # ~4 MiB per tile buffer; double-buffered in + out => ~16 MiB VMEM.
        target_tile_bytes = 4 * 1024 * 1024
        tile_rows = max(pack, (target_tile_bytes // (width * itemsize)) // pack * pack)
        # Ensure >= ~4 grid steps so both v7x TensorCores get work via the
        # "parallel" semantics and the DMA pipeline actually overlaps compute.
        cap = max(pack, (rows // 4) // pack * pack)
        block_rows = min(tile_rows, cap)

    grid = (pl.cdiv(rows, block_rows),)  # partial last block is masked by Pallas
    x2d = x.reshape(rows, width)

    extra_kwargs = {}
    if alias_input and out_dtype == in_dtype:
        extra_kwargs["input_output_aliases"] = {0: 0}

    out2d = pl.pallas_call(
        _binary_tanh_kernel,
        out_shape=jax.ShapeDtypeStruct((rows, width), out_dtype),
        grid_spec=pltpu.PrefetchScalarGridSpec(
            num_scalar_prefetch=0,
            grid=grid,
            in_specs=[pl.BlockSpec((block_rows, width), lambda i: (i, 0))],
            out_specs=pl.BlockSpec((block_rows, width), lambda i: (i, 0)),
        ),
        compiler_params=pltpu.CompilerParams(
            dimension_semantics=("parallel",),
            # 32 MiB: raises v5e's 16 MiB scoped default, equals the v6e/v7x
            # default, and stays far below v7x's 64 MiB physical VMEM.
            vmem_limit_bytes=32 * 1024 * 1024,
        ),
        **extra_kwargs,
    )(x2d)

    return out2d.reshape(orig_shape)


def _reference(x, out_dtype=None):
    out_dtype = x.dtype if out_dtype is None else out_dtype
    one = jnp.ones((), dtype=out_dtype)
    return jnp.where(jnp.clip(x, -1.0, 1.0) >= 0, one, -one)


if __name__ == "__main__":
    key = jax.random.PRNGKey(0)

    # Small NCHW input consistent with a typical BNN conv activation.
    x = jax.random.normal(key, (2, 4, 16, 16), dtype=jnp.float32) * 2.0

    # Force the Pallas path even for this small test tensor (single-block path).
    out = jax.block_until_ready(binary_tanh(x, min_pallas_elements=0))
    ref = _reference(x)
    assert out.shape == x.shape and out.dtype == x.dtype
    assert bool(jnp.all(out == ref))

    # Default path (XLA short-circuit for tiny inputs) must match too.
    out_sc = jax.block_until_ready(binary_tanh(x))
    assert bool(jnp.all(out_sc == ref))

    # Medium input exercising the multi-block grid (>= 4 steps, masked last
    # block not needed here since rows divides cleanly).
    key2 = jax.random.PRNGKey(1)
    x2 = jax.random.normal(key2, (8, 32, 32, 32), dtype=jnp.float32)
    out2 = jax.block_until_ready(binary_tanh(x2, min_pallas_elements=0))
    assert bool(jnp.all(out2 == _reference(x2)))

    print("KERNEL_OK")
</pallas_src>

<mosaic_0001>
module attributes {stable_mosaic.version = 11 : i64} {
  func.func @_binary_tanh_kernel(%arg0: i32, %arg1: memref<1x2048xf32, #tpu.memory_space<vmem>>, %arg2: memref<1x2048xf32, #tpu.memory_space<vmem>>) attributes {dimension_semantics = [#tpu.dimension_semantics<parallel>], iteration_bounds = array<i64: 1>, scalar_prefetch = 0 : i64, scratch_operands = 0 : i64, tpu.core_type = #tpu.core_type<tc>, window_params = [{transform_indices = @transform_0, window_bounds = array<i64: 1, 2048>}, {transform_indices = @transform_1, window_bounds = array<i64: 1, 2048>}]} {
    %c0 = arith.constant 0 : index
    %c0_0 = arith.constant 0 : index
    %0 = vector.load %arg1[%c0, %c0_0] : memref<1x2048xf32, #tpu.memory_space<vmem>>, vector<1x2048xf32>
    %cst = arith.constant 0.000000e+00 : f32
    %1 = vector.broadcast %cst : f32 to vector<1x2048xf32>
    %2 = arith.cmpf oge, %0, %1 : vector<1x2048xf32>
    %cst_1 = arith.constant 0.000000e+00 : f32
    %cst_2 = arith.constant 1.000000e+00 : f32
    %3 = arith.subf %cst_1, %cst_2 : f32
    %cst_3 = arith.constant 1.000000e+00 : f32
    %4 = vector.broadcast %cst_3 : f32 to vector<1x2048xf32>
    %5 = vector.broadcast %3 : f32 to vector<1x2048xf32>
    %6 = arith.select %2, %4, %5 : vector<1x2048xi1>, vector<1x2048xf32>
    %c0_4 = arith.constant 0 : index
    %c0_5 = arith.constant 0 : index
    %7 = vector.load %arg2[%c0_4, %c0_5] : memref<1x2048xf32, #tpu.memory_space<vmem>>, vector<1x2048xf32>
    tpu.vector_store %arg2[%c0_4, %c0_5], %6 {strides = array<i32>} : memref<1x2048xf32, #tpu.memory_space<vmem>>, vector<1x2048xf32>,
    return
  }
  func.func @transform_0(%arg0: i32) -> (i32, i32) {
    %c0_i32 = arith.constant 0 : i32
    %c0_i32_0 = arith.constant 0 : i32
    return %arg0, %c0_i32 : i32, i32
  }
  func.func @transform_1(%arg0: i32) -> (i32, i32) {
    %c0_i32 = arith.constant 0 : i32
    %c0_i32_0 = arith.constant 0 : i32
    return %arg0, %c0_i32 : i32, i32
  }
}

</mosaic_0001>

<bundles_post_ra>
// kernel: tpu_custom_call.1
= control target key start
LH: loop header
LB: loop body
LE: loop exit
PB: predicated region body
PF: predicated region fallthrough
CT: control target
= control target key end

     0   :  { %6 = vsyncpa [#allocation3], 0  ;;  %s110_s0 = inlined_call_operand.hbm [shape: f32[1,2048], index: 0, kind: input, shape index: {}]   ;;  %s111_s1 = inlined_call_operand.hbm [shape: f32[1,2048], index: 1, kind: output, shape index: {}]  }
   0x1   :  { %7 = vsyncpa [#allocation4], 0  ;;  %s91_s6 = smov [#allocation2]  }
   0x2   :  { %s14_s7 = sshll.u32 %s91_s6, 4  ;;  %s15_s7 = int_to_ptr.vmem [resolvable:$true] %s14_s7 }
   0x3   :  { %s55_s8 = scalar_lea.vmem %s15_s7, 256  ;;  %p60_p1 = scmp.lt.s32.totalorder %s15_s7, %s15_s7 }
   0x4   :  { %p56_p0 = scmp.ne.s32.totalorder %s15_s7, %s55_s8  ;;  %p61_p2 = scmp.lt.s32.totalorder %s55_s8, %s55_s8 }
   0x6   :  { %p62_p3 = por %p61_p2, %p60_p1 }
   0x8   :  { %p63_p4 = pnand %p62_p3, %p56_p0 }
   0xa   :  { %66 = shalt.err (!%p63_p4)
}
   0xb   :  { %17 = dma.hbm_to_vmem [thread:$0]  %s110_s0, 256, %s15_s7, [#allocation3]  }
   0xc   :  { %87 = dma.done.wait [#allocation3], 256  }
   0xd   :  { %88 = vsyncadd [#allocation3], 4294967040  ;;  %s92_s11 = smov [#allocation5]   ;;  %v21_v0 = vld [vmem:[#allocation2] sm:$0xff]  ;;  %v22_v1 = vld [vmem:[#allocation2 + $0x8] sm:$0xff]  ;;  %v93_v2 = vmov -1.0  }
   0xe   :  { %s35_s12 = sshll.u32 %s92_s11, 4  ;;  %vm23_vm0 = vcmp.ge.f32.partialorder %v21_v0, 0.0  ;;  %vm24_vm1 = vcmp.ge.f32.partialorder %v22_v1, 0.0  ;;  %s36_s12 = int_to_ptr.vmem [resolvable:$true] %s35_s12 }
   0xf   :  { %v25_v3 = vsel %vm23_vm0, 1.0, %v93_v2  ;;  %v26_v4 = vsel %vm24_vm1, 1.0, %v93_v2  ;;  %s67_s13 = scalar_lea.vmem %s36_s12, 256  ;;  %p72_p6 = scmp.lt.s32.totalorder %s36_s12, %s36_s12 }
  0x10   :  { %27 = vst [vmem:[#allocation5] sm:$0xff] %v25_v3  ;;  %28 = vst [vmem:[#allocation5 + $0x8] sm:$0xff] %v26_v4  ;;  %p68_p5 = scmp.ne.s32.totalorder %s36_s12, %s67_s13  ;;  %p73_p7 = scmp.lt.s32.totalorder %s67_s13, %s67_s13 }
  0x12   :  { %p74_p8 = por %p73_p7, %p72_p6 }
  0x14   :  { %p75_p9 = pnand %p74_p8, %p68_p5 }
  0x16   :  { %78 = shalt.err (!%p75_p9)
}
  0x17   :  { %38 = dma.vmem_to_hbm [thread:$0]  %s36_s12, 256, %s111_s1, [#allocation4]  }
  0x18   :  { %89 = dma.done.wait [#allocation4], 256  }
  0x19   :  { %90 = vsyncadd [#allocation4], 4294967040 }
  0x1a   :  { %42 = vsyncpa [#allocation3], 1 }
  0x1b   :  { %43 = vsyncpa [#allocation4], 1 }

</bundles_post_ra>
